<compile_context>
chip_gen: v6e
topology: v6e:2x2x1
jax: 0.10.0
libtpu: 0.0.40
codegen_flags: <defaults>
</compile_context>

<pallas_src>
import math

import jax
import jax.numpy as jnp
from jax.experimental import pallas as pl
from jax.experimental.pallas import tpu as pltpu

_LANE = 128
_SUBLANE = 8
_STRIP = 64          # rows per local-vreg accumulation strip (2 acc = 16 vregs)
_MAX_TR = 256        # max rows per grid-step block
_TARGET_ROWS = 256   # row-folding target for tiny batches


def _round_up(x, m):
    return -(-x // m) * m


def _largest_divisor(n, cap, multiple_of=1):
    """Largest d with d | n, d % multiple_of == 0, d <= cap (or None)."""
    best = None
    d = 1
    while d * d <= n:
        if n % d == 0:
            for c in (d, n // d):
                if c <= cap and c % multiple_of == 0 and (best is None or c > best):
                    best = c
        d += 1
    return best


def _pick_tr(rows_p, cap):
    """Largest row-block height (multiple of 8, divides rows_p, <= cap),
    preferring an even row-block count so v7x's two TensorCores split evenly."""
    cap = max(_SUBLANE, min(cap, rows_p))
    best = None
    for tr in range(_SUBLANE, cap + 1, _SUBLANE):
        if rows_p % tr:
            continue
        nblk = rows_p // tr
        key = ((nblk % 2 == 0) or nblk >= 16, tr)
        if best is None or key > best:
            best = key
    return best[1]


def _block_budget():
    """(per-input block element budget, vmem_limit_bytes), gated on VMEM size.

    128-MiB-VMEM chips (v5e/v6e): 2M f32 elems -> 8 MiB blocks, pipelined
    footprint ~32 MiB.  v7x (64 MiB VMEM) or unknown: 1M elems -> 4 MiB blocks,
    ~17 MiB footprint — safely under the 32 MiB scoped default.
    """
    try:
        info = pltpu.get_tpu_info()
        vmem = getattr(info, "vmem_capacity_bytes", None) or getattr(info, "vmem_bytes", 0)
        if vmem and vmem >= 100 * 1024 * 1024:
            return 2 * 1024 * 1024, 64 * 1024 * 1024
    except Exception:
        pass
    return 1024 * 1024, 32 * 1024 * 1024


def _make_kernel(tr, td, k_blocks):
    """Accumulate xy = sum(x*y) and s2 = sum(x*x + y*y) lane-wise.

    Pure VPU multiply-adds on (<=64, 128) f32 tiles held in local vregs; each
    64-row strip touches the resident (tr, 128) output accumulators once per
    grid step.  The outputs stay resident across the 'arbitrary' k axis.
    """
    n_full = td // _LANE
    strips = [(lo, min(lo + _STRIP, tr)) for lo in range(0, tr, _STRIP)]

    def kernel(pre_ref, tar_ref, xy_ref, s2_ref):
        if k_blocks > 1:
            k = pl.program_id(1)

            @pl.when(k == 0)
            def _init():
                xy_ref[...] = jnp.zeros_like(xy_ref)
                s2_ref[...] = jnp.zeros_like(s2_ref)

        for lo, hi in strips:
            h = hi - lo
            xy = jnp.zeros((h, _LANE), jnp.float32)
            s2 = jnp.zeros((h, _LANE), jnp.float32)
            for j in range(n_full):
                c0 = j * _LANE
                xs = pre_ref[lo:hi, c0:c0 + _LANE].astype(jnp.float32)
                ys = tar_ref[lo:hi, c0:c0 + _LANE].astype(jnp.float32)
                xy = xy + xs * ys
                s2 = s2 + (xs * xs + ys * ys)
            if k_blocks > 1:
                xy_ref[lo:hi, :] += xy
                s2_ref[lo:hi, :] += s2
            else:
                xy_ref[lo:hi, :] = xy
                s2_ref[lo:hi, :] = s2

    return kernel


def tanimoto_loss(pre, tar):
    """Tanimoto loss matching TanimotoLoss.forward.  pre/tar: (N, C, H, W)."""
    assert pre.shape == tar.shape
    N = pre.shape[0]
    D = math.prod(pre.shape[1:])
    itemsize = max(pre.dtype.itemsize, tar.dtype.itemsize)

    block_elems, vmem_limit = _block_budget()
    if itemsize <= 2:
        block_elems *= 2   # 16-bit inputs: same byte budget, 2x elements

    # --- Row folding (free contiguous reshape) -----------------------------
    # Fold each sample's D into R rows of width D2 = D // R so rows fill the
    # 8 sublanes, the 'parallel' row axis gets >=2 blocks (v7x megacore), and
    # D2 stays wide enough for MiB-scale blocks.
    R = 1
    m = _SUBLANE // math.gcd(N, _SUBLANE)
    if m > 1 and D % m == 0:
        R = m
    pref_min_d2 = max(_LANE, block_elems // _MAX_TR)
    while (N * R < _TARGET_ROWS and D % (2 * R) == 0 and D // (2 * R) >= _LANE
           and (N * R < 2 * _SUBLANE or D // (2 * R) >= pref_min_d2)):
        R *= 2
    rows, D2 = N * R, D // R

    # --- Tile selection -----------------------------------------------------
    rows_p = _round_up(rows, _SUBLANE)           # pad rows only if needed
    lanes0 = _round_up(D2, _LANE)

    tr_needed = _round_up(max(_SUBLANE, block_elems // lanes0), _SUBLANE)
    tr = _pick_tr(rows_p, min(_MAX_TR, max(_STRIP, tr_needed)))

    td_cap = max(_LANE, (block_elems // tr) // _LANE * _LANE)
    td_cap = min(td_cap, lanes0)
    if D2 % _LANE == 0:
        # Common case: exact tiling, no wrapper padding.
        td = _largest_divisor(D2, td_cap, _LANE) or _LANE
        k_blocks = D2 // td
        D2_p = D2
    else:
        # Degenerate case: zero-pad lanes (zeros contribute nothing to xy/s2).
        k_blocks = -(-lanes0 // td_cap)
        td = _round_up(-(-lanes0 // k_blocks), _LANE)
        D2_p = k_blocks * td

    pre2 = pre.reshape(rows, D2)
    tar2 = tar.reshape(rows, D2)
    if rows_p != rows or D2_p != D2:
        pad = ((0, rows_p - rows), (0, D2_p - D2))
        pre2 = jnp.pad(pre2, pad)
        tar2 = jnp.pad(tar2, pad)

    grid = (rows_p // tr, k_blocks)
    in_bs = pl.BlockSpec((tr, td), lambda r, k: (r, k))
    out_bs = pl.BlockSpec((tr, _LANE), lambda r, k: (r, 0))
    out_sds = jax.ShapeDtypeStruct((rows_p, _LANE), jnp.float32)

    xy_p, s2_p = pl.pallas_call(
        _make_kernel(tr, td, k_blocks),
        out_shape=(out_sds, out_sds),
        grid_spec=pl.GridSpec(
            grid=grid,
            in_specs=[in_bs, in_bs],
            out_specs=(out_bs, out_bs),
        ),
        compiler_params=pltpu.CompilerParams(
            dimension_semantics=("parallel", "arbitrary"),
            vmem_limit_bytes=vmem_limit,
        ),
        cost_estimate=pl.CostEstimate(
            flops=6 * rows_p * D2_p,
            transcendentals=0,
            bytes_accessed=(pre2.size * pre2.dtype.itemsize
                            + tar2.size * tar2.dtype.itemsize
                            + 2 * rows_p * _LANE * 4),
        ),
    )(pre2, tar2)

    # Tiny JAX epilogue: drop padded rows, fold lanes + the R folded rows of
    # each sample, then the Tanimoto ratio and batch mean.  (An all-zero
    # sample gives 0/0 = NaN, exactly like the PyTorch reference.)
    xy = xy_p[:rows].reshape(N, -1).sum(axis=1)
    s2 = s2_p[:rows].reshape(N, -1).sum(axis=1)
    t = 1.0 - xy / (s2 - xy)
    return t.mean()


def _reference_loss(pre, tar):
    N = pre.shape[0]
    x = pre.reshape(N, -1).astype(jnp.float32)
    y = tar.reshape(N, -1).astype(jnp.float32)
    xy = (x * y).sum(1)
    xx = (x * x).sum(1)
    yy = (y * y).sum(1)
    t = 1.0 - xy / (xx + yy - xy)
    return t.mean()


if __name__ == "__main__":
    key = jax.random.PRNGKey(0)
    k1, k2 = jax.random.split(key)
    # Small NCHW shapes consistent with the module's forward.
    N, C, H, W = 2, 4, 16, 16
    pre = jax.random.uniform(k1, (N, C, H, W), dtype=jnp.float32)
    tar = (jax.random.uniform(k2, (N, C, H, W), dtype=jnp.float32) > 0.5).astype(
        jnp.float32
    )

    loss = jax.block_until_ready(tanimoto_loss(pre, tar))
    ref = jax.block_until_ready(_reference_loss(pre, tar))

    assert jnp.allclose(loss, ref, rtol=1e-5, atol=1e-5), (loss, ref)
    print("KERNEL_OK")
</pallas_src>

<mosaic_0001>
module attributes {stable_mosaic.version = 11 : i64} {
  func.func @kernel(%arg0: i32, %arg1: i32, %arg2: memref<8x128xf32, #tpu.memory_space<vmem>>, %arg3: memref<8x128xf32, #tpu.memory_space<vmem>>, %arg4: memref<8x128xf32, #tpu.memory_space<vmem>>, %arg5: memref<8x128xf32, #tpu.memory_space<vmem>>) attributes {dimension_semantics = [#tpu.dimension_semantics<parallel>, #tpu.dimension_semantics<arbitrary>], iteration_bounds = array<i64: 2, 1>, scalar_prefetch = 0 : i64, scratch_operands = 0 : i64, tpu.core_type = #tpu.core_type<tc>, window_params = [{transform_indices = @transform_0, window_bounds = array<i64: 8, 128>}, {transform_indices = @transform_1, window_bounds = array<i64: 8, 128>}, {transform_indices = @transform_2, window_bounds = array<i64: 8, 128>}, {transform_indices = @transform_3, window_bounds = array<i64: 8, 128>}]} {
    %cst = arith.constant 0.000000e+00 : f32
    %0 = vector.broadcast %cst : f32 to vector<8x128xf32>
    %cst_0 = arith.constant 0.000000e+00 : f32
    %1 = vector.broadcast %cst_0 : f32 to vector<8x128xf32>
    %c0 = arith.constant 0 : index
    %c0_1 = arith.constant 0 : index
    %2 = vector.load %arg2[%c0, %c0_1] : memref<8x128xf32, #tpu.memory_space<vmem>>, vector<8x128xf32>
    %c0_2 = arith.constant 0 : index
    %c0_3 = arith.constant 0 : index
    %3 = vector.load %arg3[%c0_2, %c0_3] : memref<8x128xf32, #tpu.memory_space<vmem>>, vector<8x128xf32>
    %4 = arith.mulf %2, %3 : vector<8x128xf32>
    %5 = arith.addf %0, %4 : vector<8x128xf32>
    %6 = arith.mulf %2, %2 : vector<8x128xf32>
    %7 = arith.mulf %3, %3 : vector<8x128xf32>
    %8 = arith.addf %6, %7 : vector<8x128xf32>
    %9 = arith.addf %1, %8 : vector<8x128xf32>
    %c0_4 = arith.constant 0 : index
    %c0_5 = arith.constant 0 : index
    %10 = vector.load %arg4[%c0_4, %c0_5] : memref<8x128xf32, #tpu.memory_space<vmem>>, vector<8x128xf32>
    tpu.vector_store %arg4[%c0_4, %c0_5], %5 {strides = array<i32>} : memref<8x128xf32, #tpu.memory_space<vmem>>, vector<8x128xf32>,
    %c0_6 = arith.constant 0 : index
    %c0_7 = arith.constant 0 : index
    %11 = vector.load %arg5[%c0_6, %c0_7] : memref<8x128xf32, #tpu.memory_space<vmem>>, vector<8x128xf32>
    tpu.vector_store %arg5[%c0_6, %c0_7], %9 {strides = array<i32>} : memref<8x128xf32, #tpu.memory_space<vmem>>, vector<8x128xf32>,
    return
  }
  func.func @transform_0(%arg0: i32, %arg1: i32) -> (i32, i32) {
    %c0_i32 = arith.constant 0 : i32
    return %arg0, %arg1 : i32, i32
  }
  func.func @transform_1(%arg0: i32, %arg1: i32) -> (i32, i32) {
    %c0_i32 = arith.constant 0 : i32
    return %arg0, %arg1 : i32, i32
  }
  func.func @transform_2(%arg0: i32, %arg1: i32) -> (i32, i32) {
    %c0_i32 = arith.constant 0 : i32
    %c0_i32_0 = arith.constant 0 : i32
    return %arg0, %c0_i32 : i32, i32
  }
  func.func @transform_3(%arg0: i32, %arg1: i32) -> (i32, i32) {
    %c0_i32 = arith.constant 0 : i32
    %c0_i32_0 = arith.constant 0 : i32
    return %arg0, %c0_i32 : i32, i32
  }
}

</mosaic_0001>

<bundles_post_ra>
// kernel: tpu_custom_call.1
= control target key start
LH: loop header
LB: loop body
LE: loop exit
PB: predicated region body
PF: predicated region fallthrough
CT: control target
= control target key end

     0   :  { %9 = vsyncpa [#allocation3], 0  ;;  %s924_s0 = inlined_call_operand.hbm [shape: f32[16,128], index: 0, kind: input, shape index: {}]   ;;  %s925_s1 = inlined_call_operand.hbm [shape: f32[16,128], index: 1, kind: input, shape index: {}]   ;;  %s926_s2 = inlined_call_operand.hbm [shape: f32[16,128], index: 2, kind: output, shape index: {0}]   ;;  %s927_s3 = inlined_call_operand.hbm [shape: f32[16,128], index: 3, kind: output, shape index: {1}]  }
   0x1   :  { %11 = vsyncpa [#allocation3 + $0x1], 0 }
   0x2   :  { %12 = vsyncpa [#allocation6], 0 }
   0x3   :  { %14 = vsyncpa [#allocation6 + $0x1], 0 }
   0x4   :  { %15 = vsyncpa [#allocation4], 0 }
   0x5   :  { %17 = vsyncpa [#allocation4 + $0x1], 0 }
   0x6   :  { %18 = vsyncpa [#allocation9], 0 }
   0x7   :  { %20 = vsyncpa [#allocation9 + $0x1], 0  ;;  %s713_s12 = smov 0   ;;  %s715_s13 = smov 0  }
   0x8   :  { %s717_s14 = smov 0   ;;  %s719_s15 = smov 0  }
   0x9   :  { %s721_s16 = smov 0   ;;  %s723_s17 = smov 0  }
   0xa LB: > { %s426_s18 = sadd.s32 4294967295, %s687_s17   ;;  %s427_s19 = sadd.s32 4294967294, %s687_s17   ;;  %s687_s17 = sphi %s723_s17, %s26_s17   ;;  %s683_s16 = sphi %s721_s16, %s939_s16   ;;  %s679_s15 = sphi %s719_s15, %s938_s15   ;;  %s675_s14 = sphi %s717_s14, %s937_s14   ;;  %s671_s13 = sphi %s715_s13, %s936_s13   ;;  %s667_s12 = sphi %s713_s12, %s935_s12  }
   0xb   : > { %s38_s20 = sadd.s32 1, %s683_s16  ;;  %s47_s21 = sadd.s32 1, %s675_s14 }
   0xc   : > { %p40_p0 = scmp.ge.s32.totalorder %s38_s20, 2  ;;  %p54_p1 = scmp.ne.s32.totalorder %s675_s14, %s671_s13 }
   0xd   : > { %p55_p2 = scmp.eq.s32.totalorder %s687_s17, 0  ;;  %p60_p3 = scmp.ne.s32.totalorder %s671_s13, %s667_s12 }
   0xe   : > { %s941_s20 = smov (%p40_p0, %s38_s20), 0  ;;  %p61_p5 = scmp.eq.s32.totalorder %s426_s18, 0 }
   0xf   : > { %p754_p4 = por %p55_p2, %p54_p1  ;;  %s42_s23 = ssub.s32 %s683_s16, %s941_s20 }
  0x10   : > { %p112_p6 = scmp.eq.s32.totalorder %s426_s18, 1  ;;  %p45_p7 = scmp.eq.s32.totalorder %s42_s23, 0 }
  0x11   : > { %p760_p8 = por %p61_p5, %p60_p3  ;;  %p118_p10 = scmp.eq.s32.totalorder %s427_s19, 1 }
  0x12   : > { %p764_p9 = por %p112_p6, %p54_p1  ;;  %p467_p13 = scmp.lt.s32.totalorder %s687_s17, 2 }
  0x13   : > { %s769_s26 = scalar_select %p45_p7, %s675_s14, %s47_s21  }
  0x14   : > { %p771_p11 = por %p118_p10, %p60_p3  ;;  %s778_s28 = sand.u32 1, %s675_s14  }
  0x15   : > { %s430_s29 = sshll.u32 %s778_s28, 3  ;;  %s431_s30 = sshll.u32 %s683_s16, 7 }
  0x16   : > { %s174_s6 = scalar_lea.hbm %s924_s0, %s431_s30  ;;  %s168_s7 = scalar_lea.vmem [#allocation2], %s430_s29 }
  0x17   : > { %s176_s8 = sshll.u32 %s168_s7, 4  ;;  %p787_p0 = pnand %p467_p13, %p754_p4  ;;  %s177_s8 = int_to_ptr.vmem [resolvable:$true] %s176_s8 }
  0x18   : > { %p434_p1 = scmp.ge.s32.totalorder %s687_s17, 1  ;;  %p200_p2 = scmp.lt.s32.totalorder %s687_s17, 3 }
  0x19   : > { %s165_s10 = scalar_lea.sflag [#allocation3], %s778_s28  ;;  %p519_p3 = pneg %p787_p0 }
  0x1a   : > { %s530_s11 = scalar_lea.vmem %s177_s8, 128  ;;  %s689_s18 = smov [#allocation2]  }
  0x1b   : > { %p531_p5 = scmp.ne.s32.totalorder %s177_s8, %s530_s11  ;;  %s535_s19 = sshll.u32 %s689_s18, 4  ;;  %s536_s19 = int_to_ptr.vmem [resolvable:$false] %s535_s19 }
  0x1c   : > { %s537_s21 = scalar_lea.vmem %s536_s19, 256  ;;  %p538_p4 = scmp.lt.s32.totalorder %s177_s8, %s536_s19 }
  0x1d   : > { %p533_p6 = pnand %p531_p5, %p519_p3  ;;  %p539_p10 = scmp.lt.s32.totalorder %s537_s21, %s530_s11 }
  0x1f   : > { %p534_p7 = pneg %p533_p6  ;;  %p540_p13 = por %p539_p10, %p538_p4 }
  0x21   : > { %p541_p12 = pnand %p540_p13, %p534_p7 }
  0x23   : > { %544 = shalt.err (!%p541_p12)
}
  0x24   : > { %456 = dma.hbm_to_vmem [thread:$0]  (!%p787_p0), %s174_s6, 128, %s177_s8, %s165_s10  }
  0x25   : > { %p805_p5 = pnand %p434_p1, %p200_p2  ;;  %s193_s5 = scalar_lea.hbm %s925_s1, %s431_s30 }
  0x26   : > { %s187_s7 = scalar_lea.vmem [#allocation5], %s430_s29  ;;  %s184_s18 = scalar_lea.sflag [#allocation6], %s778_s28 }
  0x27   : > { %s195_s11 = sshll.u32 %s187_s7, 4  ;;  %s690_s6 = smov [#allocation5]   ;;  %s196_s11 = int_to_ptr.vmem [resolvable:$true] %s195_s11 }
  0x28   : > { %s558_s19 = scalar_lea.vmem %s196_s11, 128  ;;  %s563_s8 = sshll.u32 %s690_s6, 4  ;;  %s564_s8 = int_to_ptr.vmem [resolvable:$false] %s563_s8 }
  0x29   : > { %p559_p12 = scmp.ne.s32.totalorder %s196_s11, %s558_s19  ;;  %s565_s10 = scalar_lea.vmem %s564_s8, 256 }
  0x2a   : > { %p566_p1 = scmp.lt.s32.totalorder %s196_s11, %s564_s8  ;;  %p567_p2 = scmp.lt.s32.totalorder %s565_s10, %s558_s19 }
  0x2b   : > { %p561_p6 = pnand %p559_p12, %p519_p3 }
  0x2c   : > { %p568_p4 = por %p567_p2, %p566_p1 }
  0x2d   : > { %p562_p7 = pneg %p561_p6 }
  0x2f   : > { %p569_p10 = pnand %p568_p4, %p562_p7 }
  0x31   : > { %572 = shalt.err (!%p569_p10)
}
  0x32   : > { %459 = dma.hbm_to_vmem [thread:$0]  (!%p787_p0), %s193_s5, 128, %s196_s11, %s184_s18  }
  0x33   : > { %204 = sbr.rel (%p805_p5) target bundleno = 106 (0x6a), region = 28  ;;  %s821_s28 = sand.u32 (!%p805_p5), 1, %s671_s13  }
  0x34   : > { %s824_s29 = sshll.u32 (!%p805_p5), %s821_s28, 3  ;;  %s207_s30 = scalar_lea.sflag (!%p805_p5), [#allocation3], %s821_s28 }
  0x35   : > { %s210_s21 = scalar_lea.vmem (!%p805_p5), [#allocation2], %s824_s29 }
  0x38   : > { %650 = dma.done.wait (%p760_p8), %s207_s30, 128  }
  0x39   : > { %652 = vsyncadd (%p760_p8), %s207_s30, 4294967168  ;;  %s216_s9 = scalar_lea.sflag [#allocation6], %s821_s28  ;;  %s219_s22 = scalar_lea.vmem [#allocation5], %s824_s29 }
  0x3a   : > { %654 = dma.done.wait (%p760_p8), %s216_s9, 128  }
  0x3b   : > { %656 = vsyncadd (%p760_p8), %s216_s9, 4294967168  ;;  %s244_s23 = scalar_lea.vmem [#allocation7], %s824_s29  ;;  %s441_s5 = sshll.u32 %s679_s15, 7  ;;  %v252_v0 = vld [vmem:[%s210_s21] sm:$0xff]  ;;  %v253_v1 = vld [vmem:[%s219_s22] sm:$0xff] }
  0x3c   : > { %s281_s4 = sshll.u32 %s244_s23, 4  ;;  %s251_s7 = scalar_lea.vmem [#allocation8], %s824_s29  ;;  %v254_v2 = vmul.f32 %v253_v1, %v252_v0  ;;  %v256_v3 = vmul.f32 %v252_v0, %v252_v0  ;;  %v257_v4 = vmul.f32 %v253_v1, %v253_v1  ;;  %s843_s4 = int_to_ptr.vmem [resolvable:$true] %s281_s4 }
  0x3d   : > { %s294_s11 = sshll.u32 %s251_s7, 4  ;;  %s848_s19 = scalar_lea.hbm %s926_s2, %s441_s5  ;;  %s850_s11 = int_to_ptr.vmem [resolvable:$true] %s294_s11 }
  0x3e   : > { %260 = vst [vmem:[%s244_s23] sm:$0xff] %v254_v2  ;;  %v258_v5 = vadd.f32 %v257_v4, %v256_v3  ;;  %s855_s8 = scalar_lea.hbm %s927_s3, %s441_s5  ;;  %s263_s10 = scalar_lea.sflag [#allocation4], %s821_s28 }
  0x3f   : > { %s573_s30 = scalar_lea.vmem %s843_s4, 128  ;;  %s691_s21 = smov [#allocation7]  }
  0x40   : > { %p574_p8 = scmp.ne.s32.totalorder %s843_s4, %s573_s30  ;;  %s577_s9 = sshll.u32 %s691_s21, 4  ;;  %s578_s9 = int_to_ptr.vmem [resolvable:$false] %s577_s9 }
  0x41   : > { %s579_s22 = scalar_lea.vmem %s578_s9, 256  ;;  %p580_p13 = scmp.lt.s32.totalorder %s843_s4, %s578_s9 }
  0x42   : > { %p575_p0 = pnand %p574_p8, %p764_p9  ;;  %p581_p5 = scmp.lt.s32.totalorder %s579_s22, %s573_s30 }
  0x44   : > { %p576_p3 = pneg %p575_p0  ;;  %p582_p12 = por %p581_p5, %p580_p13 }
  0x46   : > { %p583_p6 = pnand %p582_p12, %p576_p3 }
  0x48   : > { %586 = shalt.err (!%p583_p6)
}
  0x49   : > { %s587_s23 = scalar_lea.hbm %s848_s19, 128  ;;  %s591_s18 = scalar_lea.hbm %s926_s2, 256 }
  0x4a   : > { %p588_p7 = scmp.ne.s32.totalorder %s848_s19, %s587_s23  ;;  %p592_p4 = scmp.lt.s32.totalorder %s848_s19, %s926_s2 }
  0x4b   : > { %p593_p10 = scmp.lt.s32.totalorder %s591_s18, %s587_s23 }
  0x4c   : > { %p589_p1 = pnand %p588_p7, %p764_p9 }
  0x4d   : > { %p594_p8 = por %p593_p10, %p592_p4 }
  0x4e   : > { %p590_p2 = pneg %p589_p1 }
  0x50   : > { %p595_p0 = pnand %p594_p8, %p590_p2 }
  0x52   : > { %598 = shalt.err (!%p595_p0)
}
  0x53   : > { %449 = dma.vmem_to_hbm [thread:$0]  (%p764_p9), %s843_s4, 128, %s848_s19, %s263_s10   ;;  %261 = vst [vmem:[%s251_s7] sm:$0xff] %v258_v5 }
  0x54   : > { %s268_s30 = scalar_lea.sflag [#allocation9], %s821_s28  ;;  %s599_s21 = scalar_lea.vmem %s850_s11, 128 }
  0x55   : > { %p600_p3 = scmp.ne.s32.totalorder %s850_s11, %s599_s21  ;;  %s692_s9 = smov [#allocation8]  }
  0x56   : > { %s603_s22 = sshll.u32 %s692_s9, 4  ;;  %s604_s22 = int_to_ptr.vmem [resolvable:$false] %s603_s22 }
  0x57   : > { %p601_p13 = pnand %p600_p3, %p764_p9  ;;  %s605_s23 = scalar_lea.vmem %s604_s22, 256 }
  0x58   : > { %p606_p12 = scmp.lt.s32.totalorder %s850_s11, %s604_s22  ;;  %p607_p6 = scmp.lt.s32.totalorder %s605_s23, %s599_s21 }
  0x59   : > { %p602_p5 = pneg %p601_p13 }
  0x5a   : > { %p608_p7 = por %p607_p6, %p606_p12 }
  0x5c   : > { %p609_p1 = pnand %p608_p7, %p602_p5 }
  0x5e   : > { %612 = shalt.err (!%p609_p1)
}
  0x5f   : > { %s613_s29 = scalar_lea.hbm %s855_s8, 128  ;;  %s617_s7 = scalar_lea.hbm %s927_s3, 256 }
  0x60   : > { %p614_p2 = scmp.ne.s32.totalorder %s855_s8, %s613_s29  ;;  %p618_p8 = scmp.lt.s32.totalorder %s855_s8, %s927_s3 }
  0x61   : > { %p619_p0 = scmp.lt.s32.totalorder %s617_s7, %s613_s29 }
  0x62   : > { %p615_p4 = pnand %p614_p2, %p764_p9 }
  0x63   : > { %p620_p3 = por %p619_p0, %p618_p8 }
  0x64   : > { %p616_p10 = pneg %p615_p4 }
  0x66   : > { %p621_p13 = pnand %p620_p3, %p616_p10 }
  0x68   : > { %624 = shalt.err (!%p621_p13)
}
  0x69   : > { %450 = dma.vmem_to_hbm [thread:$0]  (%p764_p9), %s850_s11, 128, %s855_s8, %s268_s30  }
  0x6a PF: > { %s306_s5 = sand.u32 1, %s667_s12   ;;  %p934_p5 = scmp.ge.s32.totalorder %s687_s17, 2 }
  0x6b   : > { %s307_s24 = scalar_lea.sflag [#allocation4], %s306_s5 }
  0x6c   : > { %p461_p12 = pnand %p934_p5, %p771_p11 }
  0x6e   : > { %p462_p6 = pneg %p461_p12 }
  0x70   : > { %658 = dma.done.wait (%p462_p6), %s307_s24, 128  }
  0x71   : > { %660 = vsyncadd (%p462_p6), %s307_s24, 4294967168  ;;  %s316_s18 = scalar_lea.sflag [#allocation9], %s306_s5 }
  0x72   : > { %662 = dma.done.wait (%p462_p6), %s316_s18, 128  }
  0x73   : > { %664 = vsyncadd (%p462_p6), %s316_s18, 4294967168  ;;  %s26_s17 = sadd.s32 1, %s687_s17   ;;  %s935_s12 = smov %s671_s13 }
  0x74   : > { %p23_p7 = scmp.ge.s32.totalorder %s26_s17, 4   ;;  %s936_s13 = smov %s675_s14 }
  0x75   : > { %s937_s14 = smov %s769_s26  ;;  %s938_s15 = smov %s683_s16 }
  0x76   : > { %s939_s16 = smov %s941_s20  ;;  %25 = sbr.rel (!%p23_p7) target bundleno = 10 (0xa), region = 103 }
  0x7b   :  { %321 = vsyncpa [#allocation3], 1 }
  0x7c   :  { %323 = vsyncpa [#allocation3 + $0x1], 1 }
  0x7d   :  { %324 = vsyncpa [#allocation6], 1 }
  0x7e   :  { %326 = vsyncpa [#allocation6 + $0x1], 1 }
  0x7f   :  { %327 = vsyncpa [#allocation4], 1 }
  0x80   :  { %329 = vsyncpa [#allocation4 + $0x1], 1 }
  0x81   :  { %330 = vsyncpa [#allocation9], 1 }
  0x82   :  { %332 = vsyncpa [#allocation9 + $0x1], 1 }

</bundles_post_ra>
